<compile_context>
chip_gen: v6e
topology: v6e:2x2x1
jax: 0.10.0
libtpu: 0.0.40
codegen_flags: <defaults>
</compile_context>

<pallas_src>
import functools

import jax
import jax.numpy as jnp
from jax.experimental import pallas as pl
from jax.experimental.pallas import tpu as pltpu


def _moving_avg_kernel(pos_ref, x_ref, o_ref, *, feat, kernel_size,
                       pad_left, pad_right):
    """Moving average along the lane axis of a [Ts, L] block.

    L = groups * feat: `groups` independent length-`feat` rows packed along
    lanes.  pos_ref holds each lane's within-row position ([1, L] int32).
    Replication padding is realized as:
      * in-range taps: pltpu.roll by |shift| + mask-to-zero outside the row,
      * edge corrections: (# of out-of-range taps) * the row's edge value,
        applied only at the lanes that need them.
    """
    x = x_ref[...].astype(jnp.float32)
    rows, L = x.shape
    pos = jnp.broadcast_to(pos_ref[...], (rows, L))      # hoisted once

    acc = x                                              # tap d = 0 (always valid)
    if pad_left > 0:    # pad_left taps clamp to the row's first element
        acc = acc + jnp.where(pos == 0, x * float(pad_left), 0.0)
    if pad_right > 0:   # pad_right taps clamp to the row's last element
        acc = acc + jnp.where(pos == feat - 1, x * float(pad_right), 0.0)

    # One roll per |shift|, shared by the in-range tap and the edge-count
    # correction at that |shift|.  Rolls use the XLU slot and co-issue with
    # the VPU selects/adds.
    for s in range(1, min(max(pad_left, pad_right), feat - 1) + 1):
        if s <= pad_left:
            rolled = pltpu.roll(x, shift=s, axis=1)             # x[.., j - s]
            acc = acc + jnp.where(pos >= s, rolled, 0.0)        # tap d = -s
            if s < pad_left:                                    # clamped taps at pos == s
                acc = acc + jnp.where(pos == s,
                                      rolled * float(pad_left - s), 0.0)
        if s <= pad_right:
            rolled = pltpu.roll(x, shift=L - s, axis=1)         # x[.., j + s]
            acc = acc + jnp.where(pos < feat - s, rolled, 0.0)  # tap d = +s
            if s < pad_right:                                   # clamped taps at pos == feat-1-s
                acc = acc + jnp.where(pos == feat - 1 - s,
                                      rolled * float(pad_right - s), 0.0)

    o_ref[...] = (acc * (1.0 / kernel_size)).astype(o_ref.dtype)


def _choose_group(rows: int, feat: int) -> int:
    """Largest number of rows to pack into the 128-lane axis (lane density)."""
    if feat >= 128:
        return 1
    g = max(1, 128 // feat)
    while g > 1 and rows % g != 0:
        g -= 1
    return g


def _choose_block_rows(num_rows: int, lane: int) -> int:
    """Row-tile size: ~4 MiB of f32 working set per block, multiple of 8."""
    target_f32_bytes = 4 * 1024 * 1024
    ts = max(1, target_f32_bytes // (lane * 4))
    if ts >= num_rows:
        return num_rows               # full-extent block (always a legal shape)
    return max(8, (ts // 8) * 8)      # sublane-aligned partial tiling


def _vmem_limit_bytes(ts: int, lane: int, in_itemsize: int, out_itemsize: int) -> int:
    """Explicit scoped-VMEM budget: double-buffered in/out blocks plus ~6
    tile-sized f32 intermediates, capped safely below v7x's 64 MiB/TC."""
    blk = ts * lane
    need = 2 * blk * in_itemsize + 2 * blk * out_itemsize + 6 * blk * 4 + (2 << 20)
    return int(min(max(need, 32 << 20), 56 << 20))


def moving_average(x, kernel_size: int):
    """Pallas equivalent of MovingAverage(kernel_size).forward(x). x: [B, S, F]."""
    B, S, F = x.shape
    pad_left = (kernel_size - 1) // 2
    pad_right = kernel_size - pad_left - 1
    rows = B * S

    # Lane-dense packing: view the contiguous [rows, F] slab as [rows/G, G*F].
    G = _choose_group(rows, F)
    L = G * F
    R = rows // G
    x2 = x.reshape(R, L)

    ts = _choose_block_rows(R, L)
    grid_len = pl.cdiv(R, ts)
    # v7x megacore: keep >= 4 grid steps when the problem allows it so the
    # single "parallel" axis can shard across both TensorCores.
    while grid_len < 4 and ts > 8:
        new_ts = max(8, ((ts // 2) + 7) // 8 * 8)
        if new_ts >= ts:
            break
        ts = new_ts
        grid_len = pl.cdiv(R, ts)

    # Within-row lane positions (tiny constant; computed host-side so the
    # kernel needs no vector integer mod).
    pos = (jnp.arange(L, dtype=jnp.int32) % F).reshape(1, L)

    itemsize = jnp.dtype(x.dtype).itemsize
    kernel = functools.partial(
        _moving_avg_kernel,
        feat=F,
        kernel_size=kernel_size,
        pad_left=pad_left,
        pad_right=pad_right,
    )

    out = pl.pallas_call(
        kernel,
        out_shape=jax.ShapeDtypeStruct((R, L), x.dtype),
        grid=(grid_len,),
        in_specs=[
            pl.BlockSpec((1, L), lambda r: (0, 0)),     # lane-position table
            pl.BlockSpec((ts, L), lambda r: (r, 0)),    # row block
        ],
        out_specs=pl.BlockSpec((ts, L), lambda r: (r, 0)),
        compiler_params=pltpu.CompilerParams(
            dimension_semantics=("parallel",),
            vmem_limit_bytes=_vmem_limit_bytes(ts, L, itemsize, itemsize),
        ),
    )(pos, x2)
    return out.reshape(B, S, F)


def _reference(x, kernel_size: int):
    """Pure-JAX reference matching the PyTorch module exactly."""
    pad_left = (kernel_size - 1) // 2
    pad_right = kernel_size - pad_left - 1
    xpad = jnp.pad(x, ((0, 0), (0, 0), (pad_left, pad_right)), mode="edge")
    F = x.shape[-1]
    windows = jnp.stack(
        [xpad[:, :, t:t + F] for t in range(kernel_size)], axis=0
    )
    return jnp.mean(windows, axis=0).astype(x.dtype)


if __name__ == "__main__":
    key = jax.random.PRNGKey(0)
    B, S, F = 2, 8, 16          # [bs, seq_len, features] per the module docstring
    kernel_size = 5

    x = jax.random.normal(key, (B, S, F), dtype=jnp.float32)

    out = moving_average(x, kernel_size)
    out = jax.block_until_ready(out)

    ref = _reference(x, kernel_size)
    assert out.shape == (B, S, F)
    assert jnp.allclose(out, ref, atol=1e-5, rtol=1e-5)

    print("KERNEL_OK")
</pallas_src>

<mosaic_0001>
module attributes {stable_mosaic.version = 11 : i64} {
  func.func @_moving_avg_kernel(%arg0: i32, %arg1: memref<1x128xi32, #tpu.memory_space<vmem>>, %arg2: memref<2x128xf32, #tpu.memory_space<vmem>>, %arg3: memref<2x128xf32, #tpu.memory_space<vmem>>) attributes {dimension_semantics = [#tpu.dimension_semantics<parallel>], iteration_bounds = array<i64: 1>, scalar_prefetch = 0 : i64, scratch_operands = 0 : i64, tpu.core_type = #tpu.core_type<tc>, window_params = [{pipeline_mode = #tpu.pipeline_mode<synchronous>, transform_indices = @transform_0, window_bounds = array<i64: 1, 128>}, {transform_indices = @transform_1, window_bounds = array<i64: 2, 128>}, {transform_indices = @transform_2, window_bounds = array<i64: 2, 128>}]} {
    %c0 = arith.constant 0 : index
    %c0_0 = arith.constant 0 : index
    %0 = vector.load %arg2[%c0, %c0_0] : memref<2x128xf32, #tpu.memory_space<vmem>>, vector<2x128xf32>
    %c0_1 = arith.constant 0 : index
    %c0_2 = arith.constant 0 : index
    %1 = vector.load %arg1[%c0_1, %c0_2] : memref<1x128xi32, #tpu.memory_space<vmem>>, vector<1x128xi32>
    %2 = vector.shape_cast %1 : vector<1x128xi32> to vector<1x128xi32>
    %3 = vector.broadcast %2 : vector<1x128xi32> to vector<2x128xi32>
    %c0_i32 = arith.constant 0 : i32
    %4 = vector.broadcast %c0_i32 : i32 to vector<2x128xi32>
    %5 = arith.cmpi eq, %3, %4 : vector<2x128xi32>
    %cst = arith.constant 2.000000e+00 : f32
    %6 = vector.broadcast %cst : f32 to vector<2x128xf32>
    %7 = arith.mulf %0, %6 : vector<2x128xf32>
    %cst_3 = arith.constant 0.000000e+00 : f32
    %8 = vector.broadcast %cst_3 : f32 to vector<2x128xf32>
    %9 = arith.select %5, %7, %8 : vector<2x128xi1>, vector<2x128xf32>
    %10 = arith.addf %0, %9 : vector<2x128xf32>
    %c15_i32 = arith.constant 15 : i32
    %11 = vector.broadcast %c15_i32 : i32 to vector<2x128xi32>
    %12 = arith.cmpi eq, %3, %11 : vector<2x128xi32>
    %cst_4 = arith.constant 2.000000e+00 : f32
    %13 = vector.broadcast %cst_4 : f32 to vector<2x128xf32>
    %14 = arith.mulf %0, %13 : vector<2x128xf32>
    %cst_5 = arith.constant 0.000000e+00 : f32
    %15 = vector.broadcast %cst_5 : f32 to vector<2x128xf32>
    %16 = arith.select %12, %14, %15 : vector<2x128xi1>, vector<2x128xf32>
    %17 = arith.addf %10, %16 : vector<2x128xf32>
    %c1_i32 = arith.constant 1 : i32
    %18 = tpu.dynamic_rotate %0 by %c1_i32 dim 1 : vector<2x128xf32>, i32 -> vector<2x128xf32>
    %c1_i32_6 = arith.constant 1 : i32
    %19 = vector.broadcast %c1_i32_6 : i32 to vector<2x128xi32>
    %20 = arith.cmpi sge, %3, %19 : vector<2x128xi32>
    %cst_7 = arith.constant 0.000000e+00 : f32
    %21 = vector.broadcast %cst_7 : f32 to vector<2x128xf32>
    %22 = arith.select %20, %18, %21 : vector<2x128xi1>, vector<2x128xf32>
    %23 = arith.addf %17, %22 : vector<2x128xf32>
    %c1_i32_8 = arith.constant 1 : i32
    %24 = vector.broadcast %c1_i32_8 : i32 to vector<2x128xi32>
    %25 = arith.cmpi eq, %3, %24 : vector<2x128xi32>
    %cst_9 = arith.constant 1.000000e+00 : f32
    %26 = vector.broadcast %cst_9 : f32 to vector<2x128xf32>
    %27 = arith.mulf %18, %26 : vector<2x128xf32>
    %cst_10 = arith.constant 0.000000e+00 : f32
    %28 = vector.broadcast %cst_10 : f32 to vector<2x128xf32>
    %29 = arith.select %25, %27, %28 : vector<2x128xi1>, vector<2x128xf32>
    %30 = arith.addf %23, %29 : vector<2x128xf32>
    %c127_i32 = arith.constant 127 : i32
    %31 = tpu.dynamic_rotate %0 by %c127_i32 dim 1 : vector<2x128xf32>, i32 -> vector<2x128xf32>
    %c15_i32_11 = arith.constant 15 : i32
    %32 = vector.broadcast %c15_i32_11 : i32 to vector<2x128xi32>
    %33 = arith.cmpi slt, %3, %32 : vector<2x128xi32>
    %cst_12 = arith.constant 0.000000e+00 : f32
    %34 = vector.broadcast %cst_12 : f32 to vector<2x128xf32>
    %35 = arith.select %33, %31, %34 : vector<2x128xi1>, vector<2x128xf32>
    %36 = arith.addf %30, %35 : vector<2x128xf32>
    %c14_i32 = arith.constant 14 : i32
    %37 = vector.broadcast %c14_i32 : i32 to vector<2x128xi32>
    %38 = arith.cmpi eq, %3, %37 : vector<2x128xi32>
    %cst_13 = arith.constant 1.000000e+00 : f32
    %39 = vector.broadcast %cst_13 : f32 to vector<2x128xf32>
    %40 = arith.mulf %31, %39 : vector<2x128xf32>
    %cst_14 = arith.constant 0.000000e+00 : f32
    %41 = vector.broadcast %cst_14 : f32 to vector<2x128xf32>
    %42 = arith.select %38, %40, %41 : vector<2x128xi1>, vector<2x128xf32>
    %43 = arith.addf %36, %42 : vector<2x128xf32>
    %c2_i32 = arith.constant 2 : i32
    %44 = tpu.dynamic_rotate %0 by %c2_i32 dim 1 : vector<2x128xf32>, i32 -> vector<2x128xf32>
    %c2_i32_15 = arith.constant 2 : i32
    %45 = vector.broadcast %c2_i32_15 : i32 to vector<2x128xi32>
    %46 = arith.cmpi sge, %3, %45 : vector<2x128xi32>
    %cst_16 = arith.constant 0.000000e+00 : f32
    %47 = vector.broadcast %cst_16 : f32 to vector<2x128xf32>
    %48 = arith.select %46, %44, %47 : vector<2x128xi1>, vector<2x128xf32>
    %49 = arith.addf %43, %48 : vector<2x128xf32>
    %c126_i32 = arith.constant 126 : i32
    %50 = tpu.dynamic_rotate %0 by %c126_i32 dim 1 : vector<2x128xf32>, i32 -> vector<2x128xf32>
    %c14_i32_17 = arith.constant 14 : i32
    %51 = vector.broadcast %c14_i32_17 : i32 to vector<2x128xi32>
    %52 = arith.cmpi slt, %3, %51 : vector<2x128xi32>
    %cst_18 = arith.constant 0.000000e+00 : f32
    %53 = vector.broadcast %cst_18 : f32 to vector<2x128xf32>
    %54 = arith.select %52, %50, %53 : vector<2x128xi1>, vector<2x128xf32>
    %55 = arith.addf %49, %54 : vector<2x128xf32>
    %cst_19 = arith.constant 2.000000e-01 : f32
    %56 = vector.broadcast %cst_19 : f32 to vector<2x128xf32>
    %57 = arith.mulf %55, %56 : vector<2x128xf32>
    %c0_20 = arith.constant 0 : index
    %c0_21 = arith.constant 0 : index
    %58 = vector.load %arg3[%c0_20, %c0_21] : memref<2x128xf32, #tpu.memory_space<vmem>>, vector<2x128xf32>
    tpu.vector_store %arg3[%c0_20, %c0_21], %57 {strides = array<i32>} : memref<2x128xf32, #tpu.memory_space<vmem>>, vector<2x128xf32>,
    return
  }
  func.func @transform_0(%arg0: i32) -> (i32, i32) {
    %c0_i32 = arith.constant 0 : i32
    %c0_i32_0 = arith.constant 0 : i32
    %c0_i32_1 = arith.constant 0 : i32
    return %c0_i32, %c0_i32_0 : i32, i32
  }
  func.func @transform_1(%arg0: i32) -> (i32, i32) {
    %c0_i32 = arith.constant 0 : i32
    %c0_i32_0 = arith.constant 0 : i32
    return %arg0, %c0_i32 : i32, i32
  }
  func.func @transform_2(%arg0: i32) -> (i32, i32) {
    %c0_i32 = arith.constant 0 : i32
    %c0_i32_0 = arith.constant 0 : i32
    return %arg0, %c0_i32 : i32, i32
  }
}

</mosaic_0001>

<bundles_post_ra>
// kernel: tpu_custom_call.1
= control target key start
LH: loop header
LB: loop body
LE: loop exit
PB: predicated region body
PF: predicated region fallthrough
CT: control target
= control target key end

     0   :  { %7 = vsyncpa [#allocation3], 0  ;;  %s198_s0 = inlined_call_operand.hbm [shape: s32[1,128], index: 0, kind: input, shape index: {}]   ;;  %s199_s1 = inlined_call_operand.hbm [shape: f32[2,128], index: 1, kind: input, shape index: {}]   ;;  %s200_s2 = inlined_call_operand.hbm [shape: f32[2,128], index: 2, kind: output, shape index: {}]  }
   0x1   :  { %8 = vsyncpa [#allocation6], 0 }
   0x2   :  { %9 = vsyncpa [#allocation4], 0  ;;  %s167_s9 = smov [#allocation2]   ;;  %s168_s11 = smov [#allocation5]  }
   0x3   :  { %s16_s10 = sshll.u32 %s167_s9, 4  ;;  %s26_s12 = sshll.u32 %s168_s11, 4  ;;  %s17_s10 = int_to_ptr.vmem [resolvable:$true] %s16_s10  ;;  %s27_s12 = int_to_ptr.vmem [resolvable:$true] %s26_s12 }
   0x4   :  { %s109_s13 = scalar_lea.vmem %s17_s10, 16  ;;  %s113_s14 = scalar_lea.vmem %s17_s10, 32 }
   0x5   :  { %p110_p0 = scmp.ne.s32.totalorder %s17_s10, %s109_s13  ;;  %p114_p1 = scmp.lt.s32.totalorder %s17_s10, %s17_s10 }
   0x6   :  { %p115_p2 = scmp.lt.s32.totalorder %s113_s14, %s109_s13 }
   0x8   :  { %p116_p3 = por %p115_p2, %p114_p1 }
   0xa   :  { %p117_p4 = pnand %p116_p3, %p110_p0 }
   0xc   :  { %120 = shalt.err (!%p117_p4)
}
   0xd   :  { %19 = dma.hbm_to_vmem [thread:$0]  %s198_s0, 16, %s17_s10, [#allocation3]  }
   0xe   :  { %s129_s17 = scalar_lea.vmem %s27_s12, 32  ;;  %p134_p6 = scmp.lt.s32.totalorder %s27_s12, %s27_s12 }
   0xf   :  { %p130_p5 = scmp.ne.s32.totalorder %s27_s12, %s129_s17  ;;  %p135_p7 = scmp.lt.s32.totalorder %s129_s17, %s129_s17 }
  0x11   :  { %p136_p8 = por %p135_p7, %p134_p6 }
  0x13   :  { %p137_p9 = pnand %p136_p8, %p130_p5 }
  0x15   :  { %140 = shalt.err (!%p137_p9)
}
  0x16   :  { %29 = dma.hbm_to_vmem [thread:$0]  %s199_s1, 32, %s27_s12, [#allocation6]  }
  0x17   :  { %161 = dma.done.wait [#allocation3], 16  }
  0x18   :  { %162 = vsyncadd [#allocation3], 4294967280 }
  0x19   :  { %163 = dma.done.wait [#allocation6], 32  }
  0x1a   :  { %164 = vsyncadd [#allocation6], 4294967264  ;;  %v36_v0 = vld [vmem:[#allocation5] sm:$0x3]  ;;  %s169_s20 = smov 1   ;;  %s170_s21 = smov 2  }
  0x1b   :  { %49 = vrot.lane.b32.xlu0 %v36_v0, %s169_s20  ;;  %65 = vrot.lane.b32.xlu1 %v36_v0, %s170_s21  ;;  %s171_s0 = smov 127   ;;  %s172_s22 = smov 126   ;;  %v93_v1 = vld [vmem:[#allocation2] ss:$0 sm:$0xff]  ;;  %v43_v2 = vmul.f32 2.0, %v36_v0 }
  0x1c   :  { %vm42_vm0 = vcmp.eq.s32.totalorder %v93_v1, 0  ;;  %vm46_vm1 = vcmp.eq.s32.totalorder %v93_v1, 15  ;;  %vm51_vm2 = vcmp.ge.s32.totalorder %v93_v1, 1  ;;  %vm54_vm3 = vcmp.eq.s32.totalorder %v93_v1, 1  ;;  %s173_s1 = smov [#allocation7]  }
  0x1d   :  { %v44_v3 = vsel %vm42_vm0, %v43_v2, 0.0  ;;  %v47_v5 = vsel %vm46_vm1, %v43_v2, 0.0  ;;  %vm59_vm4 = vcmp.lt.s32.totalorder %v93_v1, 15  ;;  %vm62_vm5 = vcmp.eq.s32.totalorder %v93_v1, 14  ;;  %s83_s23 = sshll.u32 %s173_s1, 4  ;;  %s84_s23 = int_to_ptr.vmem [resolvable:$true] %s83_s23 }
  0x1e   :  { %v45_v4 = vadd.f32 %v44_v3, %v36_v0  ;;  %vm67_vm6 = vcmp.ge.s32.totalorder %v93_v1, 2  ;;  %vm72_vm7 = vcmp.lt.s32.totalorder %v93_v1, 14  ;;  %s141_s24 = scalar_lea.vmem %s84_s23, 32  ;;  %p146_p11 = scmp.lt.s32.totalorder %s84_s23, %s84_s23 }
  0x1f   :  { %57 = vrot.lane.b32.xlu0 %v36_v0, %s171_s0  ;;  %70 = vrot.lane.b32.xlu1 %v36_v0, %s172_s22  ;;  %p142_p10 = scmp.ne.s32.totalorder %s84_s23, %s141_s24  ;;  %p147_p12 = scmp.lt.s32.totalorder %s141_s24, %s141_s24 }
  0x20   :  { %v48_v6 = vadd.f32 %v47_v5, %v45_v4 }
  0x21   :  { %p148_p13 = por %p147_p12, %p146_p11 }
  0x23   :  { %p149_p0 = pnand %p148_p13, %p142_p10 }
  0x8d   :  { %v50_v7 = vpop.permute.xlu0 %49  ;;  %v66_v8 = vpop.permute.xlu1 %65 }
  0x8e   :  { %v52_v9 = vsel %vm51_vm2, %v50_v7, 0.0  ;;  %v55_v11 = vsel %vm54_vm3, %v50_v7, 0.0  ;;  %v68_v19 = vsel %vm67_vm6, %v66_v8, 0.0 }
  0x8f   :  { %v53_v10 = vadd.f32 %v52_v9, %v48_v6 }
  0x91   :  { %v56_v12 = vadd.f32 %v55_v11, %v53_v10  ;;  %v58_v13 = vpop.permute.xlu0 %57  ;;  %v71_v16 = vpop.permute.xlu1 %70 }
  0x92   :  { %v60_v14 = vsel %vm59_vm4, %v58_v13, 0.0  ;;  %v63_v17 = vsel %vm62_vm5, %v58_v13, 0.0  ;;  %v73_v20 = vsel %vm72_vm7, %v71_v16, 0.0 }
  0x93   :  { %v61_v15 = vadd.f32 %v60_v14, %v56_v12 }
  0x95   :  { %v64_v18 = vadd.f32 %v63_v17, %v61_v15 }
  0x97   :  { %v69_v21 = vadd.f32 %v68_v19, %v64_v18 }
  0x99   :  { %v74_v22 = vadd.f32 %v73_v20, %v69_v21 }
  0x9b   :  { %v75_v23 = vmul.f32 0.2, %v74_v22 }
  0x9d   :  { %76 = vst [vmem:[#allocation7] sm:$0x3] %v75_v23 }
  0x9e   :  { %152 = shalt.err (!%p149_p0)
}
  0x9f   :  { %86 = dma.vmem_to_hbm [thread:$0]  %s84_s23, 32, %s200_s2, [#allocation4]  }
  0xa0   :  { %165 = dma.done.wait [#allocation4], 32  }
  0xa1   :  { %166 = vsyncadd [#allocation4], 4294967264 }
  0xa2   :  { %90 = vsyncpa [#allocation3], 1 }
  0xa3   :  { %91 = vsyncpa [#allocation6], 1 }
  0xa4   :  { %92 = vsyncpa [#allocation4], 1 }

</bundles_post_ra>
